<compile_context>
chip_gen: v6e
topology: v6e:2x2x1
jax: 0.10.0
libtpu: 0.0.40
codegen_flags: <defaults>
</compile_context>

<pallas_src>
import functools

import jax
import jax.numpy as jnp
from jax.experimental import pallas as pl
from jax.experimental.pallas import tpu as pltpu

LANE = 128


def _round_up(x, m):
    return ((x + m - 1) // m) * m


# ------------------------------ fused block kernel ---------------------------

def _make_block_kernel(K, dilation, L, cin_p, cout_p, has_down, out_dtype):
    """One batch element of a full TemporalBlock, NLC layout, padded channels.

    Refs (per grid step over batch):
      x_ref  : (L, cin_p)            bf16 block input
      w1_ref : (K*cin_p, cout_p)     bf16 conv1 taps stacked along contraction
      b1_ref : (1, cout_p)           f32
      w2_ref : (K*cout_p, cout_p)    bf16 conv2 taps stacked along contraction
      b2_ref : (1, cout_p)           f32
      wd_ref : (cin_p, cout_p)       bf16 1x1 downsample   (only if has_down)
      bd_ref : (1, cout_p)           f32                   (only if has_down)
      o_ref  : (L, cout_p)           bf16 block output
    Scratch (VMEM, f32 so unaligned sublane slices stay simple):
      xpad_ref : (L+pad, cin_p)   causally left-padded input
      hpad_ref : (L+pad, cout_p)  causally left-padded conv1 output
    """
    pad = (K - 1) * dilation

    def kernel(x_ref, w1_ref, b1_ref, w2_ref, b2_ref, *rest):
        if has_down:
            wd_ref, bd_ref, o_ref, xpad_ref, hpad_ref = rest
        else:
            o_ref, xpad_ref, hpad_ref = rest

        # ---- causal left-pad of the input: zero head + data tail, all in VMEM ----
        if pad > 0:
            xpad_ref[pl.ds(0, pad), :] = jnp.zeros((pad, cin_p), jnp.float32)
        xpad_ref[pl.ds(pad, L), :] = x_ref[...].astype(jnp.float32)

        # ---- conv1 + bias + relu: stack K dilated taps into one deep matmul ----
        xs = jnp.concatenate(
            [xpad_ref[pl.ds(t * dilation, L), :] for t in range(K)], axis=1)
        h1 = jnp.dot(xs.astype(jnp.bfloat16), w1_ref[...],
                     preferred_element_type=jnp.float32)
        h1 = jnp.maximum(h1 + b1_ref[...], 0.0)

        # ---- causal left-pad of the conv1 output (never leaves VMEM) ----
        if pad > 0:
            hpad_ref[pl.ds(0, pad), :] = jnp.zeros((pad, cout_p), jnp.float32)
        hpad_ref[pl.ds(pad, L), :] = h1

        # ---- conv2 + bias + relu ----
        hs = jnp.concatenate(
            [hpad_ref[pl.ds(t * dilation, L), :] for t in range(K)], axis=1)
        h2 = jnp.dot(hs.astype(jnp.bfloat16), w2_ref[...],
                     preferred_element_type=jnp.float32)
        h2 = jnp.maximum(h2 + b2_ref[...], 0.0)

        # ---- residual branch (1x1 conv or identity) + final relu ----
        if has_down:
            res = jnp.dot(x_ref[...], wd_ref[...],
                          preferred_element_type=jnp.float32) + bd_ref[...]
        else:
            res = x_ref[...].astype(jnp.float32)

        o_ref[...] = jnp.maximum(h2 + res, 0.0).astype(out_dtype)

    return kernel


def temporal_block_forward(x_nlc, layer, *, dilation,
                           compute_dtype=jnp.bfloat16):
    """Fused TemporalBlock: x_nlc (N, L, cin_p) -> (N, L, cout_p)."""
    N, L, cin_p = x_nlc.shape
    K, _, cout_p = layer["w1"].shape
    pad = (K - 1) * dilation
    has_down = "wd" in layer

    # Stack conv taps along the contraction dim: (K, Cin_p, Cout_p) -> (K*Cin_p, Cout_p)
    w1 = layer["w1"].reshape(K * cin_p, cout_p)
    w2 = layer["w2"].reshape(K * cout_p, cout_p)

    kernel = _make_block_kernel(K, dilation, L, cin_p, cout_p, has_down,
                                compute_dtype)

    in_specs = [
        pl.BlockSpec((None, L, cin_p), lambda n: (n, 0, 0)),     # x (batch-squeezed)
        pl.BlockSpec((K * cin_p, cout_p), lambda n: (0, 0)),     # w1 (resident)
        pl.BlockSpec((1, cout_p), lambda n: (0, 0)),             # b1
        pl.BlockSpec((K * cout_p, cout_p), lambda n: (0, 0)),    # w2
        pl.BlockSpec((1, cout_p), lambda n: (0, 0)),             # b2
    ]
    args = [x_nlc, w1, layer["b1"], w2, layer["b2"]]
    if has_down:
        in_specs += [
            pl.BlockSpec((cin_p, cout_p), lambda n: (0, 0)),     # wd
            pl.BlockSpec((1, cout_p), lambda n: (0, 0)),         # bd
        ]
        args += [layer["wd"], layer["bd"]]

    # NOTE: whole-L per batch element fits VMEM comfortably up to L ~ 16K at 128
    # lanes; for longer sequences add an L-tile grid axis with a (K-1)*dilation halo.
    return pl.pallas_call(
        kernel,
        out_shape=jax.ShapeDtypeStruct((N, L, cout_p), compute_dtype),
        grid=(N,),
        in_specs=in_specs,
        out_specs=pl.BlockSpec((None, L, cout_p), lambda n: (n, 0, 0)),
        scratch_shapes=[
            pltpu.VMEM((L + pad, cin_p), jnp.float32),
            pltpu.VMEM((L + pad, cout_p), jnp.float32),
        ],
        compiler_params=pltpu.CompilerParams(
            dimension_semantics=("parallel",)),
    )(*args)


# ----------------------------- parameter setup ------------------------------

def _weight_norm_effective(v, g):
    """PyTorch weight_norm (dim=0): w = g * v / ||v||_2 over (Cin, K) per out-channel."""
    norm = jnp.sqrt(jnp.sum(v * v, axis=(1, 2), keepdims=True))
    return g[:, None, None] * v / norm


def init_tcn_params(key, num_inputs, num_channels, kernel_size,
                    compute_dtype=jnp.bfloat16):
    """Deterministic synthetic parameters matching TemporalConvNet.__init__ shapes,
    zero-padded on the channel axes to 128-lane multiples (padded lanes stay
    exactly zero through relu/residual, so they never leak into real outputs)."""
    params = []
    in_ch = num_inputs
    for i, out_ch in enumerate(num_channels):
        cin_p = _round_up(in_ch, LANE)
        cout_p = _round_up(out_ch, LANE)
        keys = jax.random.split(jax.random.fold_in(key, i), 8)

        v1 = 0.01 * jax.random.normal(keys[0], (out_ch, in_ch, kernel_size), jnp.float32)
        g1 = 0.5 + jnp.abs(0.1 * jax.random.normal(keys[1], (out_ch,), jnp.float32))
        b1 = 0.01 * jax.random.normal(keys[2], (out_ch,), jnp.float32)
        v2 = 0.01 * jax.random.normal(keys[3], (out_ch, out_ch, kernel_size), jnp.float32)
        g2 = 0.5 + jnp.abs(0.1 * jax.random.normal(keys[4], (out_ch,), jnp.float32))
        b2 = 0.01 * jax.random.normal(keys[5], (out_ch,), jnp.float32)

        # (Cout, Cin, K) -> (K, Cin, Cout)
        w1 = jnp.transpose(_weight_norm_effective(v1, g1), (2, 1, 0))
        w2 = jnp.transpose(_weight_norm_effective(v2, g2), (2, 1, 0))

        w1p = jnp.zeros((kernel_size, cin_p, cout_p), jnp.float32)
        w1p = w1p.at[:, :in_ch, :out_ch].set(w1)
        w2p = jnp.zeros((kernel_size, cout_p, cout_p), jnp.float32)
        w2p = w2p.at[:, :out_ch, :out_ch].set(w2)
        b1p = jnp.zeros((1, cout_p), jnp.float32).at[0, :out_ch].set(b1)
        b2p = jnp.zeros((1, cout_p), jnp.float32).at[0, :out_ch].set(b2)

        layer = {
            "w1": w1p.astype(compute_dtype),
            "b1": b1p,                        # biases kept f32 (added to f32 acc)
            "w2": w2p.astype(compute_dtype),
            "b2": b2p,
        }
        if in_ch != out_ch:
            wd = 0.01 * jax.random.normal(keys[6], (out_ch, in_ch, 1), jnp.float32)
            bd = 0.01 * jax.random.normal(keys[7], (out_ch,), jnp.float32)
            wd = jnp.transpose(wd, (2, 1, 0))[0]                       # (Cin, Cout)
            wdp = jnp.zeros((cin_p, cout_p), jnp.float32).at[:in_ch, :out_ch].set(wd)
            bdp = jnp.zeros((1, cout_p), jnp.float32).at[0, :out_ch].set(bd)
            layer["wd"] = wdp.astype(compute_dtype)
            layer["bd"] = bdp
        params.append(layer)
        in_ch = out_ch
    return params


# ------------------------------- forward pass --------------------------------

@functools.partial(jax.jit, static_argnums=(2,))
def tcn_forward(x_ncl, params, out_channels):
    """x_ncl: (N, C, L) like the PyTorch module.  Returns (N, out_channels, L) f32."""
    N, C, L = x_ncl.shape
    cin_p = _round_up(C, LANE)
    x = jnp.transpose(x_ncl, (0, 2, 1)).astype(jnp.bfloat16)      # NCL -> NLC
    x = jnp.pad(x, ((0, 0), (0, 0), (0, cin_p - C)))              # static lane pad only
    for i, layer in enumerate(params):
        x = temporal_block_forward(x, layer, dilation=2 ** i)     # dilation is static
    y = x[:, :, :out_channels].astype(jnp.float32)                # drop padded lanes
    return jnp.transpose(y, (0, 2, 1))                            # NLC -> NCL


# ---------------------------------- main --------------------------------------

if __name__ == "__main__":
    key = jax.random.PRNGKey(0)
    k_x, k_p = jax.random.split(key)

    N, C_in, L = 2, 4, 16
    num_channels = (8, 8)
    kernel_size = 2

    x = jax.random.normal(k_x, (N, C_in, L), dtype=jnp.float32)
    params = init_tcn_params(k_p, C_in, num_channels, kernel_size)

    y = tcn_forward(x, params, num_channels[-1])
    y = jax.block_until_ready(y)

    assert y.shape == (N, num_channels[-1], L), y.shape
    assert jnp.all(jnp.isfinite(y))
    print("KERNEL_OK")
</pallas_src>

<mosaic_0001>
module attributes {stable_mosaic.version = 11 : i64} {
  func.func @kernel(%arg0: i32, %arg1: memref<1x16x128xbf16, #tpu.memory_space<vmem>>, %arg2: memref<256x128xbf16, #tpu.memory_space<vmem>>, %arg3: memref<1x128xf32, #tpu.memory_space<vmem>>, %arg4: memref<256x128xbf16, #tpu.memory_space<vmem>>, %arg5: memref<1x128xf32, #tpu.memory_space<vmem>>, %arg6: memref<128x128xbf16, #tpu.memory_space<vmem>>, %arg7: memref<1x128xf32, #tpu.memory_space<vmem>>, %arg8: memref<1x16x128xbf16, #tpu.memory_space<vmem>>, %arg9: memref<17x128xf32, #tpu.memory_space<vmem>>, %arg10: memref<17x128xf32, #tpu.memory_space<vmem>>) attributes {dimension_semantics = [#tpu.dimension_semantics<parallel>], iteration_bounds = array<i64: 2>, scalar_prefetch = 0 : i64, scratch_operands = 2 : i64, tpu.core_type = #tpu.core_type<tc>, window_params = [{transform_indices = @transform_0, window_bounds = array<i64: 1, 16, 128>}, {pipeline_mode = #tpu.pipeline_mode<synchronous>, transform_indices = @transform_1, window_bounds = array<i64: 256, 128>}, {pipeline_mode = #tpu.pipeline_mode<synchronous>, transform_indices = @transform_2, window_bounds = array<i64: 1, 128>}, {pipeline_mode = #tpu.pipeline_mode<synchronous>, transform_indices = @transform_3, window_bounds = array<i64: 256, 128>}, {pipeline_mode = #tpu.pipeline_mode<synchronous>, transform_indices = @transform_4, window_bounds = array<i64: 1, 128>}, {pipeline_mode = #tpu.pipeline_mode<synchronous>, transform_indices = @transform_5, window_bounds = array<i64: 128, 128>}, {pipeline_mode = #tpu.pipeline_mode<synchronous>, transform_indices = @transform_6, window_bounds = array<i64: 1, 128>}, {transform_indices = @transform_7, window_bounds = array<i64: 1, 16, 128>}]} {
    %cst = arith.constant 0.000000e+00 : f32
    %0 = vector.broadcast %cst : f32 to vector<1x128xf32>
    %c0 = arith.constant 0 : index
    %c0_0 = arith.constant 0 : index
    %1 = vector.load %arg9[%c0, %c0_0] : memref<17x128xf32, #tpu.memory_space<vmem>>, vector<1x128xf32>
    tpu.vector_store %arg9[%c0, %c0_0], %0 {strides = array<i32>} : memref<17x128xf32, #tpu.memory_space<vmem>>, vector<1x128xf32>,
    %c0_1 = arith.constant 0 : index
    %c0_2 = arith.constant 0 : index
    %c0_3 = arith.constant 0 : index
    %2 = vector.load %arg1[%c0_1, %c0_2, %c0_3] : memref<1x16x128xbf16, #tpu.memory_space<vmem>>, vector<1x16x128xbf16>
    %3 = vector.shape_cast %2 : vector<1x16x128xbf16> to vector<16x128xbf16>
    %4 = arith.extf %3 : vector<16x128xbf16> to vector<16x128xf32>
    %c1 = arith.constant 1 : index
    %c0_4 = arith.constant 0 : index
    %5 = vector.load %arg9[%c1, %c0_4] : memref<17x128xf32, #tpu.memory_space<vmem>>, vector<16x128xf32>
    tpu.vector_store %arg9[%c1, %c0_4], %4 {strides = array<i32>} : memref<17x128xf32, #tpu.memory_space<vmem>>, vector<16x128xf32>,
    %c0_5 = arith.constant 0 : index
    %c0_6 = arith.constant 0 : index
    %6 = vector.load %arg9[%c0_5, %c0_6] : memref<17x128xf32, #tpu.memory_space<vmem>>, vector<16x128xf32>
    %c1_7 = arith.constant 1 : index
    %c0_8 = arith.constant 0 : index
    %7 = vector.load %arg9[%c1_7, %c0_8] : memref<17x128xf32, #tpu.memory_space<vmem>>, vector<16x128xf32>
    %8 = tpu.concatenate %6, %7 in 1 : vector<16x128xf32>, vector<16x128xf32> -> vector<16x256xf32>
    %9 = arith.truncf %8 : vector<16x256xf32> to vector<16x256xbf16>
    %c0_9 = arith.constant 0 : index
    %c0_10 = arith.constant 0 : index
    %10 = vector.load %arg2[%c0_9, %c0_10] : memref<256x128xbf16, #tpu.memory_space<vmem>>, vector<256x128xbf16>
    %cst_11 = arith.constant dense<0.000000e+00> : vector<16x128xf32>
    %11 = tpu.matmul %9, %10, %cst_11 {dimension_numbers = #tpu.dot_dimension_numbers<[1], [0], [0], [1], [0, 0, 1, 1], [], []>} : vector<16x256xbf16>, vector<256x128xbf16>, vector<16x128xf32> -> vector<16x128xf32>
    %c0_12 = arith.constant 0 : index
    %c0_13 = arith.constant 0 : index
    %12 = vector.load %arg3[%c0_12, %c0_13] : memref<1x128xf32, #tpu.memory_space<vmem>>, vector<1x128xf32>
    %13 = vector.broadcast %12 : vector<1x128xf32> to vector<16x128xf32>
    %14 = arith.addf %11, %13 : vector<16x128xf32>
    %cst_14 = arith.constant 0.000000e+00 : f32
    %15 = vector.broadcast %cst_14 : f32 to vector<16x128xf32>
    %16 = arith.maximumf %14, %15 : vector<16x128xf32>
    %cst_15 = arith.constant 0.000000e+00 : f32
    %17 = vector.broadcast %cst_15 : f32 to vector<1x128xf32>
    %c0_16 = arith.constant 0 : index
    %c0_17 = arith.constant 0 : index
    %18 = vector.load %arg10[%c0_16, %c0_17] : memref<17x128xf32, #tpu.memory_space<vmem>>, vector<1x128xf32>
    tpu.vector_store %arg10[%c0_16, %c0_17], %17 {strides = array<i32>} : memref<17x128xf32, #tpu.memory_space<vmem>>, vector<1x128xf32>,
    %c1_18 = arith.constant 1 : index
    %c0_19 = arith.constant 0 : index
    %19 = vector.load %arg10[%c1_18, %c0_19] : memref<17x128xf32, #tpu.memory_space<vmem>>, vector<16x128xf32>
    tpu.vector_store %arg10[%c1_18, %c0_19], %16 {strides = array<i32>} : memref<17x128xf32, #tpu.memory_space<vmem>>, vector<16x128xf32>,
    %c0_20 = arith.constant 0 : index
    %c0_21 = arith.constant 0 : index
    %20 = vector.load %arg10[%c0_20, %c0_21] : memref<17x128xf32, #tpu.memory_space<vmem>>, vector<16x128xf32>
    %c1_22 = arith.constant 1 : index
    %c0_23 = arith.constant 0 : index
    %21 = vector.load %arg10[%c1_22, %c0_23] : memref<17x128xf32, #tpu.memory_space<vmem>>, vector<16x128xf32>
    %22 = tpu.concatenate %20, %21 in 1 : vector<16x128xf32>, vector<16x128xf32> -> vector<16x256xf32>
    %23 = arith.truncf %22 : vector<16x256xf32> to vector<16x256xbf16>
    %c0_24 = arith.constant 0 : index
    %c0_25 = arith.constant 0 : index
    %24 = vector.load %arg4[%c0_24, %c0_25] : memref<256x128xbf16, #tpu.memory_space<vmem>>, vector<256x128xbf16>
    %cst_26 = arith.constant dense<0.000000e+00> : vector<16x128xf32>
    %25 = tpu.matmul %23, %24, %cst_26 {dimension_numbers = #tpu.dot_dimension_numbers<[1], [0], [0], [1], [0, 0, 1, 1], [], []>} : vector<16x256xbf16>, vector<256x128xbf16>, vector<16x128xf32> -> vector<16x128xf32>
    %c0_27 = arith.constant 0 : index
    %c0_28 = arith.constant 0 : index
    %26 = vector.load %arg5[%c0_27, %c0_28] : memref<1x128xf32, #tpu.memory_space<vmem>>, vector<1x128xf32>
    %27 = vector.broadcast %26 : vector<1x128xf32> to vector<16x128xf32>
    %28 = arith.addf %25, %27 : vector<16x128xf32>
    %cst_29 = arith.constant 0.000000e+00 : f32
    %29 = vector.broadcast %cst_29 : f32 to vector<16x128xf32>
    %30 = arith.maximumf %28, %29 : vector<16x128xf32>
    %c0_30 = arith.constant 0 : index
    %c0_31 = arith.constant 0 : index
    %c0_32 = arith.constant 0 : index
    %31 = vector.load %arg1[%c0_30, %c0_31, %c0_32] : memref<1x16x128xbf16, #tpu.memory_space<vmem>>, vector<1x16x128xbf16>
    %32 = vector.shape_cast %31 : vector<1x16x128xbf16> to vector<16x128xbf16>
    %c0_33 = arith.constant 0 : index
    %c0_34 = arith.constant 0 : index
    %33 = vector.load %arg6[%c0_33, %c0_34] : memref<128x128xbf16, #tpu.memory_space<vmem>>, vector<128x128xbf16>
    %cst_35 = arith.constant dense<0.000000e+00> : vector<16x128xf32>
    %34 = tpu.matmul %32, %33, %cst_35 {dimension_numbers = #tpu.dot_dimension_numbers<[1], [0], [0], [1], [0, 0, 1, 1], [], []>} : vector<16x128xbf16>, vector<128x128xbf16>, vector<16x128xf32> -> vector<16x128xf32>
    %c0_36 = arith.constant 0 : index
    %c0_37 = arith.constant 0 : index
    %35 = vector.load %arg7[%c0_36, %c0_37] : memref<1x128xf32, #tpu.memory_space<vmem>>, vector<1x128xf32>
    %36 = vector.broadcast %35 : vector<1x128xf32> to vector<16x128xf32>
    %37 = arith.addf %34, %36 : vector<16x128xf32>
    %38 = arith.addf %30, %37 : vector<16x128xf32>
    %cst_38 = arith.constant 0.000000e+00 : f32
    %39 = vector.broadcast %cst_38 : f32 to vector<16x128xf32>
    %40 = arith.maximumf %38, %39 : vector<16x128xf32>
    %41 = arith.truncf %40 : vector<16x128xf32> to vector<16x128xbf16>
    %c0_39 = arith.constant 0 : index
    %c0_40 = arith.constant 0 : index
    %c0_41 = arith.constant 0 : index
    %42 = vector.load %arg8[%c0_39, %c0_40, %c0_41] : memref<1x16x128xbf16, #tpu.memory_space<vmem>>, vector<1x16x128xbf16>
    %43 = vector.shape_cast %42 : vector<1x16x128xbf16> to vector<16x128xbf16>
    %44 = vector.shape_cast %41 : vector<16x128xbf16> to vector<1x16x128xbf16>
    tpu.vector_store %arg8[%c0_39, %c0_40, %c0_41], %44 {strides = array<i32>} : memref<1x16x128xbf16, #tpu.memory_space<vmem>>, vector<1x16x128xbf16>,
    return
  }
  func.func @transform_0(%arg0: i32) -> (i32, i32, i32) {
    %c0_i32 = arith.constant 0 : i32
    %c0_i32_0 = arith.constant 0 : i32
    %c0_i32_1 = arith.constant 0 : i32
    return %arg0, %c0_i32, %c0_i32_0 : i32, i32, i32
  }
  func.func @transform_1(%arg0: i32) -> (i32, i32) {
    %c0_i32 = arith.constant 0 : i32
    %c0_i32_0 = arith.constant 0 : i32
    %c0_i32_1 = arith.constant 0 : i32
    return %c0_i32, %c0_i32_0 : i32, i32
  }
  func.func @transform_2(%arg0: i32) -> (i32, i32) {
    %c0_i32 = arith.constant 0 : i32
    %c0_i32_0 = arith.constant 0 : i32
    %c0_i32_1 = arith.constant 0 : i32
    return %c0_i32, %c0_i32_0 : i32, i32
  }
  func.func @transform_3(%arg0: i32) -> (i32, i32) {
    %c0_i32 = arith.constant 0 : i32
    %c0_i32_0 = arith.constant 0 : i32
    %c0_i32_1 = arith.constant 0 : i32
    return %c0_i32, %c0_i32_0 : i32, i32
  }
  func.func @transform_4(%arg0: i32) -> (i32, i32) {
    %c0_i32 = arith.constant 0 : i32
    %c0_i32_0 = arith.constant 0 : i32
    %c0_i32_1 = arith.constant 0 : i32
    return %c0_i32, %c0_i32_0 : i32, i32
  }
  func.func @transform_5(%arg0: i32) -> (i32, i32) {
    %c0_i32 = arith.constant 0 : i32
    %c0_i32_0 = arith.constant 0 : i32
    %c0_i32_1 = arith.constant 0 : i32
    return %c0_i32, %c0_i32_0 : i32, i32
  }
  func.func @transform_6(%arg0: i32) -> (i32, i32) {
    %c0_i32 = arith.constant 0 : i32
    %c0_i32_0 = arith.constant 0 : i32
    %c0_i32_1 = arith.constant 0 : i32
    return %c0_i32, %c0_i32_0 : i32, i32
  }
  func.func @transform_7(%arg0: i32) -> (i32, i32, i32) {
    %c0_i32 = arith.constant 0 : i32
    %c0_i32_0 = arith.constant 0 : i32
    %c0_i32_1 = arith.constant 0 : i32
    return %arg0, %c0_i32, %c0_i32_0 : i32, i32, i32
  }
}

module attributes {stable_mosaic.version = 11 : i64} {
  func.func @kernel(%arg0: i32, %arg1: memref<1x16x128xbf16, #tpu.memory_space<vmem>>, %arg2: memref<256x128xbf16, #tpu.memory_space<vmem>>, %arg3: memref<1x128xf32, #tpu.memory_space<vmem>>, %arg4: memref<256x128xbf16, #tpu.memory_space<vmem>>, %arg5: memref<1x128xf32, #tpu.memory_space<vmem>>, %arg6: memref<1x16x128xbf16, #tpu.memory_space<vmem>>, %arg7: memref<18x128xf32, #tpu.memory_space<vmem>>, %arg8: memref<18x128xf32, #tpu.memory_space<vmem>>) attributes {dimension_semantics = [#tpu.dimension_semantics<parallel>], iteration_bounds = array<i64: 2>, scalar_prefetch = 0 : i64, scratch_operands = 2 : i64, tpu.core_type = #tpu.core_type<tc>, window_params = [{transform_indices = @transform_0, window_bounds = array<i64: 1, 16, 128>}, {pipeline_mode = #tpu.pipeline_mode<synchronous>, transform_indices = @transform_1, window_bounds = array<i64: 256, 128>}, {pipeline_mode = #tpu.pipeline_mode<synchronous>, transform_indices = @transform_2, window_bounds = array<i64: 1, 128>}, {pipeline_mode = #tpu.pipeline_mode<synchronous>, transform_indices = @transform_3, window_bounds = array<i64: 256, 128>}, {pipeline_mode = #tpu.pipeline_mode<synchronous>, transform_indices = @transform_4, window_bounds = array<i64: 1, 128>}, {transform_indices = @transform_5, window_bounds = array<i64: 1, 16, 128>}]} {
    %cst = arith.constant 0.000000e+00 : f32
    %0 = vector.broadcast %cst : f32 to vector<2x128xf32>
    %c0 = arith.constant 0 : index
    %c0_0 = arith.constant 0 : index
    %1 = vector.load %arg7[%c0, %c0_0] : memref<18x128xf32, #tpu.memory_space<vmem>>, vector<2x128xf32>
    tpu.vector_store %arg7[%c0, %c0_0], %0 {strides = array<i32>} : memref<18x128xf32, #tpu.memory_space<vmem>>, vector<2x128xf32>,
    %c0_1 = arith.constant 0 : index
    %c0_2 = arith.constant 0 : index
    %c0_3 = arith.constant 0 : index
    %2 = vector.load %arg1[%c0_1, %c0_2, %c0_3] : memref<1x16x128xbf16, #tpu.memory_space<vmem>>, vector<1x16x128xbf16>
    %3 = vector.shape_cast %2 : vector<1x16x128xbf16> to vector<16x128xbf16>
    %4 = arith.extf %3 : vector<16x128xbf16> to vector<16x128xf32>
    %c2 = arith.constant 2 : index
    %c0_4 = arith.constant 0 : index
    %5 = vector.load %arg7[%c2, %c0_4] : memref<18x128xf32, #tpu.memory_space<vmem>>, vector<16x128xf32>
    tpu.vector_store %arg7[%c2, %c0_4], %4 {strides = array<i32>} : memref<18x128xf32, #tpu.memory_space<vmem>>, vector<16x128xf32>,
    %c0_5 = arith.constant 0 : index
    %c0_6 = arith.constant 0 : index
    %6 = vector.load %arg7[%c0_5, %c0_6] : memref<18x128xf32, #tpu.memory_space<vmem>>, vector<16x128xf32>
    %c2_7 = arith.constant 2 : index
    %c0_8 = arith.constant 0 : index
    %7 = vector.load %arg7[%c2_7, %c0_8] : memref<18x128xf32, #tpu.memory_space<vmem>>, vector<16x128xf32>
    %8 = tpu.concatenate %6, %7 in 1 : vector<16x128xf32>, vector<16x128xf32> -> vector<16x256xf32>
    %9 = arith.truncf %8 : vector<16x256xf32> to vector<16x256xbf16>
    %c0_9 = arith.constant 0 : index
    %c0_10 = arith.constant 0 : index
    %10 = vector.load %arg2[%c0_9, %c0_10] : memref<256x128xbf16, #tpu.memory_space<vmem>>, vector<256x128xbf16>
    %cst_11 = arith.constant dense<0.000000e+00> : vector<16x128xf32>
    %11 = tpu.matmul %9, %10, %cst_11 {dimension_numbers = #tpu.dot_dimension_numbers<[1], [0], [0], [1], [0, 0, 1, 1], [], []>} : vector<16x256xbf16>, vector<256x128xbf16>, vector<16x128xf32> -> vector<16x128xf32>
    %c0_12 = arith.constant 0 : index
    %c0_13 = arith.constant 0 : index
    %12 = vector.load %arg3[%c0_12, %c0_13] : memref<1x128xf32, #tpu.memory_space<vmem>>, vector<1x128xf32>
    %13 = vector.broadcast %12 : vector<1x128xf32> to vector<16x128xf32>
    %14 = arith.addf %11, %13 : vector<16x128xf32>
    %cst_14 = arith.constant 0.000000e+00 : f32
    %15 = vector.broadcast %cst_14 : f32 to vector<16x128xf32>
    %16 = arith.maximumf %14, %15 : vector<16x128xf32>
    %cst_15 = arith.constant 0.000000e+00 : f32
    %17 = vector.broadcast %cst_15 : f32 to vector<2x128xf32>
    %c0_16 = arith.constant 0 : index
    %c0_17 = arith.constant 0 : index
    %18 = vector.load %arg8[%c0_16, %c0_17] : memref<18x128xf32, #tpu.memory_space<vmem>>, vector<2x128xf32>
    tpu.vector_store %arg8[%c0_16, %c0_17], %17 {strides = array<i32>} : memref<18x128xf32, #tpu.memory_space<vmem>>, vector<2x128xf32>,
    %c2_18 = arith.constant 2 : index
    %c0_19 = arith.constant 0 : index
    %19 = vector.load %arg8[%c2_18, %c0_19] : memref<18x128xf32, #tpu.memory_space<vmem>>, vector<16x128xf32>
    tpu.vector_store %arg8[%c2_18, %c0_19], %16 {strides = array<i32>} : memref<18x128xf32, #tpu.memory_space<vmem>>, vector<16x128xf32>,
    %c0_20 = arith.constant 0 : index
    %c0_21 = arith.constant 0 : index
    %20 = vector.load %arg8[%c0_20, %c0_21] : memref<18x128xf32, #tpu.memory_space<vmem>>, vector<16x128xf32>
    %c2_22 = arith.constant 2 : index
    %c0_23 = arith.constant 0 : index
    %21 = vector.load %arg8[%c2_22, %c0_23] : memref<18x128xf32, #tpu.memory_space<vmem>>, vector<16x128xf32>
    %22 = tpu.concatenate %20, %21 in 1 : vector<16x128xf32>, vector<16x128xf32> -> vector<16x256xf32>
    %23 = arith.truncf %22 : vector<16x256xf32> to vector<16x256xbf16>
    %c0_24 = arith.constant 0 : index
    %c0_25 = arith.constant 0 : index
    %24 = vector.load %arg4[%c0_24, %c0_25] : memref<256x128xbf16, #tpu.memory_space<vmem>>, vector<256x128xbf16>
    %cst_26 = arith.constant dense<0.000000e+00> : vector<16x128xf32>
    %25 = tpu.matmul %23, %24, %cst_26 {dimension_numbers = #tpu.dot_dimension_numbers<[1], [0], [0], [1], [0, 0, 1, 1], [], []>} : vector<16x256xbf16>, vector<256x128xbf16>, vector<16x128xf32> -> vector<16x128xf32>
    %c0_27 = arith.constant 0 : index
    %c0_28 = arith.constant 0 : index
    %26 = vector.load %arg5[%c0_27, %c0_28] : memref<1x128xf32, #tpu.memory_space<vmem>>, vector<1x128xf32>
    %27 = vector.broadcast %26 : vector<1x128xf32> to vector<16x128xf32>
    %28 = arith.addf %25, %27 : vector<16x128xf32>
    %cst_29 = arith.constant 0.000000e+00 : f32
    %29 = vector.broadcast %cst_29 : f32 to vector<16x128xf32>
    %30 = arith.maximumf %28, %29 : vector<16x128xf32>
    %c0_30 = arith.constant 0 : index
    %c0_31 = arith.constant 0 : index
    %c0_32 = arith.constant 0 : index
    %31 = vector.load %arg1[%c0_30, %c0_31, %c0_32] : memref<1x16x128xbf16, #tpu.memory_space<vmem>>, vector<1x16x128xbf16>
    %32 = vector.shape_cast %31 : vector<1x16x128xbf16> to vector<16x128xbf16>
    %33 = arith.extf %32 : vector<16x128xbf16> to vector<16x128xf32>
    %34 = arith.addf %30, %33 : vector<16x128xf32>
    %cst_33 = arith.constant 0.000000e+00 : f32
    %35 = vector.broadcast %cst_33 : f32 to vector<16x128xf32>
    %36 = arith.maximumf %34, %35 : vector<16x128xf32>
    %37 = arith.truncf %36 : vector<16x128xf32> to vector<16x128xbf16>
    %c0_34 = arith.constant 0 : index
    %c0_35 = arith.constant 0 : index
    %c0_36 = arith.constant 0 : index
    %38 = vector.load %arg6[%c0_34, %c0_35, %c0_36] : memref<1x16x128xbf16, #tpu.memory_space<vmem>>, vector<1x16x128xbf16>
    %39 = vector.shape_cast %38 : vector<1x16x128xbf16> to vector<16x128xbf16>
    %40 = vector.shape_cast %37 : vector<16x128xbf16> to vector<1x16x128xbf16>
    tpu.vector_store %arg6[%c0_34, %c0_35, %c0_36], %40 {strides = array<i32>} : memref<1x16x128xbf16, #tpu.memory_space<vmem>>, vector<1x16x128xbf16>,
    return
  }
  func.func @transform_0(%arg0: i32) -> (i32, i32, i32) {
    %c0_i32 = arith.constant 0 : i32
    %c0_i32_0 = arith.constant 0 : i32
    %c0_i32_1 = arith.constant 0 : i32
    return %arg0, %c0_i32, %c0_i32_0 : i32, i32, i32
  }
  func.func @transform_1(%arg0: i32) -> (i32, i32) {
    %c0_i32 = arith.constant 0 : i32
    %c0_i32_0 = arith.constant 0 : i32
    %c0_i32_1 = arith.constant 0 : i32
    return %c0_i32, %c0_i32_0 : i32, i32
  }
  func.func @transform_2(%arg0: i32) -> (i32, i32) {
    %c0_i32 = arith.constant 0 : i32
    %c0_i32_0 = arith.constant 0 : i32
    %c0_i32_1 = arith.constant 0 : i32
    return %c0_i32, %c0_i32_0 : i32, i32
  }
  func.func @transform_3(%arg0: i32) -> (i32, i32) {
    %c0_i32 = arith.constant 0 : i32
    %c0_i32_0 = arith.constant 0 : i32
    %c0_i32_1 = arith.constant 0 : i32
    return %c0_i32, %c0_i32_0 : i32, i32
  }
  func.func @transform_4(%arg0: i32) -> (i32, i32) {
    %c0_i32 = arith.constant 0 : i32
    %c0_i32_0 = arith.constant 0 : i32
    %c0_i32_1 = arith.constant 0 : i32
    return %c0_i32, %c0_i32_0 : i32, i32
  }
  func.func @transform_5(%arg0: i32) -> (i32, i32, i32) {
    %c0_i32 = arith.constant 0 : i32
    %c0_i32_0 = arith.constant 0 : i32
    %c0_i32_1 = arith.constant 0 : i32
    return %arg0, %c0_i32, %c0_i32_0 : i32, i32, i32
  }
}

</mosaic_0001>

<bundles_post_ra>
// kernel: tcn_forward.3
= control target key start
LH: loop header
LB: loop body
LE: loop exit
PB: predicated region body
PF: predicated region fallthrough
CT: control target
= control target key end

     0   :  { %s866_s18 = smov 0   ;;  %s1004_s0 = inlined_call_operand.vmem [shape: bf16[2,16,128], index: 0, kind: input, shape index: {}]   ;;  %s1005_s1 = inlined_call_operand.vmem [shape: bf16[256,128], index: 1, kind: input, shape index: {}]   ;;  %s1006_s2 = inlined_call_operand.vmem [shape: f32[1,128], index: 2, kind: input, shape index: {}]   ;;  %s1007_s3 = inlined_call_operand.vmem [shape: bf16[256,128], index: 3, kind: input, shape index: {}]   ;;  %s1008_s4 = inlined_call_operand.vmem [shape: f32[1,128], index: 4, kind: input, shape index: {}]   ;;  %s1009_s5 = inlined_call_operand.vmem [shape: bf16[2,16,128], index: 5, kind: output, shape index: {}]  }
   0x1 LB: > { %s677_s19 = sadd.s32 4294967295, %s833_s18   ;;  %p681_p0 = scmp.ge.s32.totalorder %s833_s18, 1  ;;  %s833_s18 = sphi %s866_s18, %s15_s18  }
   0x2   : > { %p187_p1 = scmp.lt.s32.totalorder %s833_s18, 3 }
   0x4   : > { %p188_p2 = pnand %p681_p0, %p187_p1 }
   0x5   : > { %p215_p3 = scmp.lt.s32.totalorder (!%p188_p2), %s677_s19, 1 }
   0x6   : > { %191 = sbr.rel (%p188_p2) target bundleno = 471 (0x1d7), region = 40 }
   0xb   : > { %v794_v0 = vld [vmem:[%s1005_s1 + $0x78] sm:$0xff]   ;;  %v796_v2 = vld [vmem:[%s1005_s1 + $0x70] sm:$0xff]   ;;  %v835_v3 = vmov 0.0   ;;  %v798_v5 = vld [vmem:[%s1005_s1 + $0x68] sm:$0xff]   ;;  %s1011_s19 = smov (!%p215_p3, %s677_s19), 1 }
   0xc   : > { %v795_v1 = vld [vmem:[%s1005_s1 + $0x38] sm:$0xff]   ;;  %741 = vmatprep.subr.bf16.mxu0 %v794_v0  ;;  %226 = vst [vmem:[#allocation2] sm:$0x3] %v835_v3  ;;  %417 = vst [vmem:[#allocation3] sm:$0x3] %v835_v3  ;;  %v797_v4 = vld [vmem:[%s1005_s1 + $0x30] sm:$0xff]  }
   0xd   : > { %742 = vmatpush3.bf16.msra.mxu0 %v795_v1  ;;  %v799_v6 = vld [vmem:[%s1005_s1 + $0x28] sm:$0xff]   ;;  %v800_v7 = vld [vmem:[%s1005_s1 + $0x60] sm:$0xff]   ;;  %s724_s9 = sshll.u32 %s1011_s19, 3  ;;  %v802_v9 = vld [vmem:[%s1005_s1 + $0x58] sm:$0xff]  }
   0xe   : > { %743 = vmatprep.subr.bf16.mxu0 %v796_v2  ;;  %v801_v8 = vld [vmem:[%s1005_s1 + $0x20] sm:$0xff]   ;;  %s219_s16 = scalar_lea.vmem %s1004_s0, %s724_s9  ;;  %v803_v10 = vld [vmem:[%s1005_s1 + $0x18] sm:$0xff]   ;;  %v804_v11 = vld [vmem:[%s1005_s1 + $0x50] sm:$0xff]   ;;  %s224_s27 = scalar_lea.vmem %s1009_s5, %s724_s9 }
   0xf   : > { %v915_v12 = vld [vmem:[%s219_s16] sm:$0xff]   ;;  %v805_v14 = vld [vmem:[%s1005_s1 + $0x10] sm:$0xff]   ;;  %v811_v17 = vld [vmem:[%s1007_s3 + $0x78] sm:$0xff]  }
  0x10   : > { %v810_v13 = vld [vmem:[%s219_s16] sm:$0xff]  ;;  %v730_v15 = vunpack.c.l.bf16 %v915_v12  ;;  %v731_v16 = vunpack.c.h.bf16 %v915_v12  ;;  %v806_v18 = vld [vmem:[%s1005_s1 + $0x48] sm:$0xff]   ;;  %v812_v19 = vld [vmem:[%s1007_s3 + $0x38] sm:$0xff]   ;;  %763 = vmatprep.subr.bf16.mxu1 %v811_v17 }
  0x11   : > { %744 = vmatpush3.bf16.msra.mxu0 %v797_v4  ;;  %406 = vmatprep.mubr.bf16.mxu0 %v810_v13  ;;  %v813_v20 = vld [vmem:[%s1007_s3 + $0x70] sm:$0xff]   ;;  %v807_v22 = vld [vmem:[%s1005_s1 + $0x8] sm:$0xff]   ;;  %v808_v23 = vld [vmem:[%s1005_s1 + $0x40] sm:$0xff]  }
  0x12   : > { %745 = vmatprep.subr.bf16.mxu0 %v798_v5  ;;  %231 = vst [vmem:[#allocation2 + $0x2] sm:$0xff] %v730_v15  ;;  %232 = vst [vmem:[#allocation2 + $0xa] sm:$0xff] %v731_v16  ;;  %764 = vmatpush3.bf16.msra.mxu1 %v812_v19  ;;  %v814_v21 = vld [vmem:[%s1007_s3 + $0x30] sm:$0xff]   ;;  %v809_v24 = vld [vmem:[%s1005_s1] sm:$0xff]  }
  0x13   : > { %765 = vmatprep.subr.bf16.mxu1 %v813_v20  ;;  %v815_v28 = vld [vmem:[%s1007_s3 + $0x68] sm:$0xff]   ;;  %v817_v30 = vld [vmem:[%s1007_s3 + $0x60] sm:$0xff]   ;;  %v819_v32 = vld [vmem:[%s1007_s3 + $0x58] sm:$0xff]  }
  0x14   : > { %v816_v29 = vld [vmem:[%s1007_s3 + $0x28] sm:$0xff]   ;;  %v818_v31 = vld [vmem:[%s1007_s3 + $0x20] sm:$0xff]   ;;  %v820_v33 = vld [vmem:[%s1007_s3 + $0x18] sm:$0xff]  }
  0x15   : > { %746 = vmatpush3.bf16.msra.mxu0 %v799_v6  ;;  %v821_v34 = vld [vmem:[%s1007_s3 + $0x50] sm:$0xff]   ;;  %v823_v36 = vld [vmem:[%s1007_s3 + $0x48] sm:$0xff]   ;;  %v825_v38 = vld [vmem:[%s1007_s3 + $0x40] sm:$0xff]  }
  0x16   : > { %747 = vmatprep.subr.bf16.mxu0 %v800_v7  ;;  %766 = vmatpush3.bf16.msra.mxu1 %v814_v21  ;;  %v822_v35 = vld [vmem:[%s1007_s3 + $0x10] sm:$0xff]   ;;  %v824_v37 = vld [vmem:[%s1007_s3 + $0x8] sm:$0xff]   ;;  %v826_v39 = vld [vmem:[%s1007_s3] sm:$0xff]  }
  0x17   : > { %767 = vmatprep.subr.bf16.mxu1 %v815_v28  ;;  %v686_v41 = vld [vmem:[%s1006_s2] ss:$0 sm:$0xff] }
  0x18   : > { %v703_v56 = vld [vmem:[%s1008_s4] ss:$0 sm:$0xff] }
  0x19   : > { %748 = vmatpush3.bf16.msra.mxu0 %v801_v8  ;;  %v233_v25 = vld [vmem:[#allocation2] sm:$0xff]  ;;  %v234_v26 = vld [vmem:[#allocation2 + $0x8] sm:$0xff] }
  0x1a   : > { %749 = vmatprep.subr.bf16.mxu0 %v802_v9  ;;  %v237_v27 = vpack.c.bf16 %v234_v26, %v233_v25  ;;  %768 = vmatpush3.bf16.msra.mxu1 %v816_v29 }
  0x1b   : > { %769 = vmatprep.subr.bf16.mxu1 %v817_v30 }
  0x1d   : > { %750 = vmatpush3.bf16.msra.mxu0 %v803_v10 }
  0x1e   : > { %751 = vmatprep.subr.bf16.mxu0 %v804_v11  ;;  %770 = vmatpush3.bf16.msra.mxu1 %v818_v31 }
  0x1f   : > { %771 = vmatprep.subr.bf16.mxu1 %v819_v32 }
  0x21   : > { %752 = vmatpush3.bf16.msra.mxu0 %v805_v14 }
  0x22   : > { %753 = vmatprep.subr.bf16.mxu0 %v806_v18  ;;  %772 = vmatpush3.bf16.msra.mxu1 %v820_v33 }
  0x23   : > { %773 = vmatprep.subr.bf16.mxu1 %v821_v34 }
  0x25   : > { %754 = vmatpush3.bf16.msra.mxu0 %v807_v22 }
  0x26   : > { %755 = vmatprep.subr.bf16.mxu0 %v808_v23  ;;  %774 = vmatpush3.bf16.msra.mxu1 %v822_v35 }
  0x27   : > { %775 = vmatprep.subr.bf16.mxu1 %v823_v36 }
  0x29   : > { %756 = vmatpush3.bf16.msra.mxu0 %v809_v24 }
  0x2a   : > { %776 = vmatpush3.bf16.msra.mxu1 %v824_v37 }
  0x2b   : > { %777 = vmatprep.subr.bf16.mxu1 %v825_v38 }
  0x2c   : > { %407 = vmatmul.mubr.bf16.vlgmr.msra.gmra.mxu0 %v237_v27 }
  0x2e   : > { %778 = vmatpush3.bf16.msra.mxu1 %v826_v39 }
  0xec   : > { %v757_v40 = vpop.f32.mrf.mxu0 }
  0xee   : > { %v758_v42 = vpop.f32.mrf.mxu0 }
  0xef   : > { %v759_v43 = vadd.f32 %v758_v42, %v757_v40 }
  0xf0   : > { %v760_v44 = vpop.f32.mrf.mxu0 }
  0xf1   : > { %v409_v45 = vadd.f32 %v759_v43, %v686_v41 }
  0xf2   : > { %v761_v46 = vpop.f32.mrf.mxu0 }
  0xf3   : > { %v415_v47 = vmax.f32 %v409_v45, 0.0  ;;  %v762_v48 = vadd.f32 %v761_v46, %v760_v44 }
  0xf5   : > { %418 = vst [vmem:[#allocation3 + $0x2] sm:$0xff] %v415_v47  ;;  %v412_v49 = vadd.f32 %v762_v48, %v686_v41 }
  0xf7   : > { %v416_v50 = vmax.f32 %v412_v49, 0.0 }
  0xf9   : > { %419 = vst [vmem:[#allocation3 + $0xa] sm:$0xff] %v416_v50  ;;  %v425_v51 = vpack.c.bf16 %v416_v50, %v415_v47 }
  0xfb   : > { %593 = vmatprep.mubr.bf16.mxu1 %v425_v51 }
  0xfc   : > { %v420_v52 = vld [vmem:[#allocation3] sm:$0xff] }
 0x100   : > { %v421_v53 = vld [vmem:[#allocation3 + $0x8] sm:$0xff] }
 0x101   : > { %v424_v54 = vpack.c.bf16 %v421_v53, %v420_v52 }
 0x103   : > { %594 = vmatmul.mubr.bf16.vlgmr.msra.gmra.mxu1 %v424_v54 }
 0x1c3   : > { %v779_v55 = vpop.f32.mrf.mxu1 }
 0x1c5   : > { %v780_v57 = vpop.f32.mrf.mxu1 }
 0x1c6   : > { %v781_v58 = vadd.f32 %v780_v57, %v779_v55 }
 0x1c7   : > { %v782_v59 = vpop.f32.mrf.mxu1 }
 0x1c8   : > { %v596_v60 = vadd.f32 %v781_v58, %v703_v56 }
 0x1c9   : > { %v783_v61 = vpop.f32.mrf.mxu1 }
 0x1ca   : > { %v602_v62 = vmax.f32 %v596_v60, 0.0  ;;  %v784_v63 = vadd.f32 %v783_v61, %v782_v59 }
 0x1cc   : > { %v599_v0 = vadd.f32 %v784_v63, %v703_v56  ;;  %v608_v1 = vadd.f32 %v730_v15, %v602_v62 }
 0x1ce   : > { %v603_v2 = vmax.f32 %v599_v0, 0.0  ;;  %v610_v4 = vmax.f32 %v608_v1, 0.0 }
 0x1d0   : > { %v609_v3 = vadd.f32 %v731_v16, %v603_v2 }
 0x1d2   : > { %v611_v5 = vmax.f32 %v609_v3, 0.0 }
 0x1d4   : > { %v739_v6 = vpack.c.bf16 %v611_v5, %v610_v4 }
 0x1d6   : > { %740 = vst [vmem:[%s224_s27] sm:$0xff] %v739_v6  }
 0x1d7 PF: > { %s15_s18 = sadd.s32 1, %s833_s18  }
 0x1d8   : > { %p12_p4 = scmp.ge.s32.totalorder %s15_s18, 4  }
 0x1da   :  { %14 = sbr.rel (!%p12_p4) target bundleno = 1 (0x1), region = 70 }

// kernel: tcn_forward.2
= control target key start
LH: loop header
LB: loop body
LE: loop exit
PB: predicated region body
PF: predicated region fallthrough
CT: control target
= control target key end

     0   :  { %12 = vsyncpa [#allocation5], 0  ;;  %s1353_s0 = inlined_call_operand.vmem [shape: bf16[2,16,128], index: 0, kind: input, shape index: {}]   ;;  %s1354_s1 = inlined_call_operand.hbm [shape: bf16[256,128], index: 1, kind: input, shape index: {}]   ;;  %s1355_s2 = inlined_call_operand.vmem [shape: f32[1,128], index: 2, kind: input, shape index: {}]   ;;  %s1356_s3 = inlined_call_operand.hbm [shape: bf16[256,128], index: 3, kind: input, shape index: {}]   ;;  %s1357_s4 = inlined_call_operand.vmem [shape: f32[1,128], index: 4, kind: input, shape index: {}]   ;;  %s1358_s5 = inlined_call_operand.vmem [shape: bf16[128,128], index: 5, kind: input, shape index: {}]   ;;  %s1359_s6 = inlined_call_operand.vmem [shape: f32[1,128], index: 6, kind: input, shape index: {}]   ;;  %s1360_s7 = inlined_call_operand.vmem [shape: bf16[2,16,128], index: 7, kind: output, shape index: {}]  }
   0x1   :  { %13 = vsyncpa [#allocation7], 0  ;;  %s1235_s24 = smov 0  }
   0x2 LB: > { %s1241_s25 = sadd.s32 4294967295, %s1187_s24   ;;  %p901_p0 = scmp.ge.s32.totalorder %s1187_s24, 1  ;;  %s1187_s24 = sphi %s1235_s24, %s19_s24  }
   0x3   : > { %p202_p1 = scmp.lt.s32.totalorder %s1187_s24, 3  ;;  %s1189_s26 = smov [#allocation4]  }
   0x4   : > { %s214_s27 = sshll.u32 %s1189_s26, 4  ;;  %p1061_p3 = scmp.eq.s32.totalorder %s1241_s25, 0  ;;  %s215_s27 = int_to_ptr.vmem [resolvable:$true] %s214_s27 }
   0x5   : > { %p1245_p2 = pnand %p901_p0, %p202_p1  ;;  %s1190_s29 = smov [#allocation6]  }
   0x6   : > { %s230_s30 = sshll.u32 %s1190_s29, 4  ;;  %s1132_s9 = scalar_lea.vmem %s215_s27, 2048  ;;  %s231_s30 = int_to_ptr.vmem [resolvable:$true] %s230_s30 }
   0x7   : > { %p1054_p4 = pneg %p1245_p2  ;;  %p1133_p7 = scmp.ne.s32.totalorder %s215_s27, %s1132_s9 }
   0x8   : > { %p1140_p10 = scmp.lt.s32.totalorder %s215_s27, %s215_s27  ;;  %p1141_p11 = scmp.lt.s32.totalorder %s1132_s9, %s1132_s9 }
   0x9   : > { %p1254_p5 = pnand %p1061_p3, %p1054_p4 }
   0xa   : > { %p1142_p12 = por %p1141_p11, %p1140_p10 }
   0xb   : > { %p1123_p6 = pneg %p1254_p5 }
   0xd   : > { %p1135_p8 = pnand %p1133_p7, %p1123_p6 }
   0xf   : > { %p1136_p9 = pneg %p1135_p8 }
  0x11   : > { %p1143_p13 = pnand %p1142_p12, %p1136_p9 }
  0x13   : > { %1146 = shalt.err (!%p1143_p13)
}
  0x14   : > { %s1191_s10 = smov 64   ;;  %s1192_s11 = smov 4  }
  0x15   : > { %1057 = dma.hbm_to_vmem [thread:$0]  (!%p1254_p5), %s1354_s1, 2048, %s215_s27, [#allocation5], %s1191_s10, %s1191_s10, %s1192_s11  }
  0x16   : > { %s1158_s14 = scalar_lea.vmem %s231_s30, 2048  ;;  %p1166_p7 = scmp.lt.s32.totalorder %s231_s30, %s231_s30 }
  0x17   : > { %p1159_p0 = scmp.ne.s32.totalorder %s231_s30, %s1158_s14  ;;  %p1167_p8 = scmp.lt.s32.totalorder %s1158_s14, %s1158_s14 }
  0x19   : > { %p1161_p1 = pnand %p1159_p0, %p1123_p6  ;;  %p1168_p10 = por %p1167_p8, %p1166_p7 }
  0x1b   : > { %p1162_p4 = pneg %p1161_p1 }
  0x1d   : > { %p1169_p9 = pnand %p1168_p10, %p1162_p4 }
  0x1f   : > { %1172 = shalt.err (!%p1169_p9)
}
  0x20   : > { %1060 = dma.hbm_to_vmem [thread:$0]  (!%p1254_p5), %s1356_s3, 2048, %s231_s30, [#allocation7], %s1191_s10, %s1191_s10, %s1192_s11  }
  0x21   : > { %263 = sbr.rel (%p1245_p2) target bundleno = 501 (0x1f5), region = 48 }
  0x26   : > { %1178 = dma.done.wait (%p1061_p3), [#allocation5], 2048  }
  0x27   : > { %1180 = vsyncadd (%p1061_p3), [#allocation5], 4294965248 }
  0x28   : > { %1182 = dma.done.wait (%p1061_p3), [#allocation7], 2048  }
  0x29   : > { %1184 = vsyncadd (%p1061_p3), [#allocation7], 4294965248  ;;  %v1193_v0 = vmov 0.0   ;;  %v1079_v1 = vld [vmem:[#allocation4 + $0x78] sm:$0xff]   ;;  %v1081_v3 = vld [vmem:[#allocation4 + $0x70] sm:$0xff]   ;;  %p299_p2 = scmp.lt.s32.totalorder %s1241_s25, 1 }
  0x2a   : > { %310 = vst [vmem:[#allocation2] sm:$0x1] %v1193_v0  ;;  %501 = vst [vmem:[#allocation3] sm:$0x1] %v1193_v0  ;;  %v1080_v2 = vld [vmem:[#allocation4 + $0x38] sm:$0xff]   ;;  %973 = vmatprep.subr.bf16.mxu0 %v1079_v1  ;;  %v1082_v4 = vld [vmem:[#allocation4 + $0x30] sm:$0xff]  }
  0x2b   : > { %974 = vmatpush3.bf16.msra.mxu0 %v1080_v2  ;;  %v1083_v5 = vld [vmem:[#allocation4 + $0x68] sm:$0xff]   ;;  %s1364_s25 = smov (!%p299_p2, %s1241_s25), 1  ;;  %v1085_v7 = vld [vmem:[#allocation4 + $0x60] sm:$0xff]   ;;  %v1087_v9 = vld [vmem:[#allocation4 + $0x58] sm:$0xff]   ;;  %vm1194_vm0 = vmmov 0  }
  0x2c   : > { %975 = vmatprep.subr.bf16.mxu0 %v1081_v3  ;;  %v1084_v6 = vld [vmem:[#allocation4 + $0x28] sm:$0xff]   ;;  %s960_s17 = sshll.u32 %s1364_s25, 3  ;;  %v1086_v8 = vld [vmem:[#allocation4 + $0x20] sm:$0xff]   ;;  %v1088_v10 = vld [vmem:[#allocation4 + $0x18] sm:$0xff]  }
  0x2d   : > { %s1298_s20 = scalar_lea.vmem %s1353_s0, %s960_s17  ;;  %v1089_v11 = vld [vmem:[#allocation4 + $0x50] sm:$0xff]   ;;  %v1096_v17 = vld [vmem:[#allocation6 + $0x78] sm:$0xff]   ;;  %v1091_v19 = vld [vmem:[#allocation4 + $0x48] sm:$0xff]   ;;  %s308_s27 = scalar_lea.vmem %s1360_s7, %s960_s17 }
  0x2e   : > { %v965_v12 = vld [vmem:[%s1298_s20] sm:$0xff]   ;;  %v1097_v18 = vld [vmem:[#allocation6 + $0x38] sm:$0xff]   ;;  %995 = vmatprep.subr.bf16.mxu1 %v1096_v17  ;;  %v1092_v21 = vld [vmem:[#allocation4 + $0x8] sm:$0xff]  }
  0x2f   : > { %976 = vmatpush3.bf16.msra.mxu0 %v1082_v4  ;;  %v1095_v13 = vld [vmem:[%s1298_s20] sm:$0xff]  ;;  %v966_v15 = vunpack.c.l.bf16 %v965_v12  ;;  %v967_v16 = vunpack.c.h.bf16 %v965_v12  ;;  %996 = vmatpush3.bf16.msra.mxu1 %v1097_v18  ;;  %v1093_v23 = vld [vmem:[#allocation4 + $0x40] sm:$0xff]   ;;  %v1098_v27 = vld [vmem:[%s1358_s5 + $0x38] sm:$0xff]  }
  0x30   : > { %977 = vmatprep.subr.bf16.mxu0 %v1083_v5  ;;  %v1090_v14 = vld [vmem:[#allocation4 + $0x10] sm:$0xff]   ;;  %490 = vmatprep.mubr.bf16.mxu0 %v1095_v13  ;;  %v1094_v24 = vld [vmem:[#allocation4] sm:$0xff]   ;;  %v1102_v30 = vld [vmem:[#allocation6 + $0x68] sm:$0xff]  }
  0x31   : > { %315 = vst [vmem:[#allocation2 + $0x1] sm:$0xff] %v966_v15  ;;  %316 = vst [vmem:[#allocation2 + $0x9] sm:$0xff] %v967_v16  ;;  %v1099_v20 = vld [vmem:[#allocation6 + $0x70] sm:$0xff]   ;;  %v1101_v29 = vld [vmem:[%s1358_s5 + $0x30] sm:$0xff]  }
  0x32   : > { %v1100_v22 = vld [vmem:[#allocation6 + $0x30] sm:$0xff]   ;;  %997 = vmatprep.subr.bf16.mxu1 %v1099_v20  ;;  %v1103_v31 = vld [vmem:[#allocation6 + $0x28] sm:$0xff]   ;;  %v1104_v32 = vld [vmem:[%s1358_s5 + $0x28] sm:$0xff]  }
  0x33   : > { %978 = vmatpush3.bf16.msra.mxu0 %v1084_v6  ;;  %998 = vmatpush3.bf16.msra.mxu1 %v1100_v22  ;;  %v1105_v33 = vld [vmem:[#allocation6 + $0x60] sm:$0xff]   ;;  %v1107_v35 = vld [vmem:[%s1358_s5 + $0x20] sm:$0xff]   ;;  %v1108_v36 = vld [vmem:[#allocation6 + $0x58] sm:$0xff]  }
  0x34   : > { %979 = vmatprep.subr.bf16.mxu0 %v1085_v7  ;;  %999 = vmatprep.subr.bf16.mxu1 %v1102_v30  ;;  %v1106_v34 = vld [vmem:[#allocation6 + $0x20] sm:$0xff]   ;;  %v1109_v37 = vld [vmem:[#allocation6 + $0x18] sm:$0xff]   ;;  %v1110_v38 = vld [vmem:[%s1358_s5 + $0x18] sm:$0xff]  }
  0x35   : > { %v1111_v39 = vld [vmem:[#allocation6 + $0x50] sm:$0xff]   ;;  %v1113_v41 = vld [vmem:[%s1358_s5 + $0x10] sm:$0xff]   ;;  %v1114_v42 = vld [vmem:[#allocation6 + $0x48] sm:$0xff]  }
  0x36   : > { %v1112_v40 = vld [vmem:[#allocation6 + $0x10] sm:$0xff]   ;;  %v1115_v43 = vld [vmem:[#allocation6 + $0x8] sm:$0xff]   ;;  %v1116_v44 = vld [vmem:[%s1358_s5 + $0x8] sm:$0xff]  }
  0x37   : > { %980 = vmatpush3.bf16.msra.mxu0 %v1086_v8  ;;  %1000 = vmatpush3.bf16.msra.mxu1 %v1103_v31  ;;  %v1117_v45 = vld [vmem:[#allocation6 + $0x40] sm:$0xff]   ;;  %v1119_v47 = vld [vmem:[%s1358_s5] sm:$0xff]  }
  0x38   : > { %981 = vmatprep.subr.bf16.mxu0 %v1087_v9  ;;  %v317_v25 = vld [vmem:[#allocation2] sm:$0xff]  ;;  %v318_v26 = vld [vmem:[#allocation2 + $0x8] sm:$0xff]  ;;  %1001 = vmatprep.subr.bf16.mxu1 %v1105_v33  ;;  %v1118_v46 = vld [vmem:[#allocation6] sm:$0xff]  }
  0x39   : > { %v321_v28 = vpack.c.bf16 %v318_v26, %v317_v25  ;;  %v1120_v48 = vld [vmem:[%s1298_s20] sm:$0xff]  }
  0x3a   : > { %v912_v50 = vld [vmem:[%s1355_s2] ss:$0 sm:$0xff] }
  0x3b   : > { %982 = vmatpush3.bf16.msra.mxu0 %v1088_v10  ;;  %1002 = vmatpush3.bf16.msra.mxu1 %v1106_v34  ;;  %v929_v5 = vld [vmem:[%s1357_s4] ss:$0 sm:$0xff] }
  0x3c   : > { %983 = vmatprep.subr.bf16.mxu0 %v1089_v11  ;;  %1003 = vmatprep.subr.bf16.mxu1 %v1108_v36  ;;  %v946_v8 = vld [vmem:[%s1359_s6] ss:$0 sm:$0xff] }
  0x3f   : > { %984 = vmatpush3.bf16.msra.mxu0 %v1090_v14  ;;  %1004 = vmatpush3.bf16.msra.mxu1 %v1109_v37 }
  0x40   : > { %985 = vmatprep.subr.bf16.mxu0 %v1091_v19  ;;  %1005 = vmatprep.subr.bf16.mxu1 %v1111_v39 }
  0x43   : > { %986 = vmatpush3.bf16.msra.mxu0 %v1092_v21  ;;  %1006 = vmatpush3.bf16.msra.mxu1 %v1112_v40 }
  0x44   : > { %987 = vmatprep.subr.bf16.mxu0 %v1093_v23  ;;  %1007 = vmatprep.subr.bf16.mxu1 %v1114_v42 }
  0x47   : > { %988 = vmatpush3.bf16.msra.mxu0 %v1094_v24  ;;  %1008 = vmatpush3.bf16.msra.mxu1 %v1115_v43 }
  0x48   : > { %1026 = vmatprep.subr.bf16.mxu0 %v1193_v0  ;;  %1009 = vmatprep.subr.bf16.mxu1 %v1117_v45 }
  0x4a   : > { %491 = vmatmul.mubr.bf16.vlgmr.msra.gmra.mxu0 %v321_v28 }
  0x4b   : > { %1027 = vmatpush3.bf16.msra.mxu0 %v1098_v27  ;;  %1042 = vmatprep.mubr.msk.bf16.mxu0 %vm1194_vm0, %v1193_v0 }
  0x4c   : > { %1028 = vmatprep.subr.bf16.mxu0 %v1193_v0  ;;  %1010 = vmatpush3.bf16.msra.mxu1 %v1118_v46 }
  0x4f   : > { %1029 = vmatpush3.bf16.msra.mxu0 %v1101_v29 }
  0x50   : > { %1030 = vmatprep.subr.bf16.mxu0 %v1193_v0 }
  0x53   : > { %1031 = vmatpush3.bf16.msra.mxu0 %v1104_v32 }
  0x54   : > { %1032 = vmatprep.subr.bf16.mxu0 %v1193_v0 }
  0x57   : > { %1033 = vmatpush3.bf16.msra.mxu0 %v1107_v35 }
  0x58   : > { %1034 = vmatprep.subr.bf16.mxu0 %v1193_v0 }
  0x5b   : > { %1035 = vmatpush3.bf16.msra.mxu0 %v1110_v38 }
  0x5c   : > { %1036 = vmatprep.subr.bf16.mxu0 %v1193_v0 }
  0x5f   : > { %1037 = vmatpush3.bf16.msra.mxu0 %v1113_v41 }
  0x60   : > { %1038 = vmatprep.subr.bf16.mxu0 %v1193_v0 }
  0x63   : > { %1039 = vmatpush3.bf16.msra.mxu0 %v1116_v44 }
  0x64   : > { %1040 = vmatprep.subr.bf16.mxu0 %v1193_v0 }
  0x67   : > { %1041 = vmatpush3.bf16.msra.mxu0 %v1119_v47 }
  0x6a   : > { %1043 = vmatmul.mubr.bf16.vlgmr.msra.gmra.mxu0 %v1120_v48 }
 0x10a   : > { %v989_v49 = vpop.f32.mrf.mxu0 }
 0x10c   : > { %v990_v51 = vpop.f32.mrf.mxu0 }
 0x10d   : > { %v991_v52 = vadd.f32 %v990_v51, %v989_v49 }
 0x10e   : > { %v992_v53 = vpop.f32.mrf.mxu0 }
 0x10f   : > { %v493_v54 = vadd.f32 %v991_v52, %v912_v50 }
 0x110   : > { %v993_v55 = vpop.f32.mrf.mxu0 }
 0x111   : > { %v499_v56 = vmax.f32 %v493_v54, 0.0  ;;  %v994_v57 = vadd.f32 %v993_v55, %v992_v53 }
 0x113   : > { %502 = vst [vmem:[#allocation3 + $0x1] sm:$0xff] %v499_v56  ;;  %v496_v58 = vadd.f32 %v994_v57, %v912_v50 }
 0x115   : > { %v500_v59 = vmax.f32 %v496_v58, 0.0 }
 0x117   : > { %503 = vst [vmem:[#allocation3 + $0x9] sm:$0xff] %v500_v59  ;;  %v509_v60 = vpack.c.bf16 %v500_v59, %v499_v56 }
 0x119   : > { %677 = vmatprep.mubr.bf16.mxu1 %v509_v60 }
 0x11a   : > { %v504_v61 = vld [vmem:[#allocation3] sm:$0xff] }
 0x11e   : > { %v505_v62 = vld [vmem:[#allocation3 + $0x8] sm:$0xff] }
 0x11f   : > { %v508_v63 = vpack.c.bf16 %v505_v62, %v504_v61 }
 0x121   : > { %678 = vmatmul.mubr.bf16.vlgmr.msra.gmra.mxu1 %v508_v63 }
 0x12a   : > { %v801_v0 = vpop.f32.mrf.mxu0 }
 0x12b   : > { %v802_v12 = vadd.f32 %v946_v8, %v801_v0 }
 0x12c   : > { %v1044_v1 = vpop.f32.mrf.mxu0 }
 0x12e   : > { %v804_v2 = vpop.f32.mrf.mxu0 }
 0x12f   : > { %v805_v17 = vadd.f32 %v946_v8, %v804_v2 }
 0x130   : > { %v1045_v3 = vpop.f32.mrf.mxu0 }
 0x1e1   : > { %v1011_v4 = vpop.f32.mrf.mxu1 }
 0x1e3   : > { %v1012_v6 = vpop.f32.mrf.mxu1 }
 0x1e4   : > { %v1013_v7 = vadd.f32 %v1012_v6, %v1011_v4 }
 0x1e5   : > { %v1014_v9 = vpop.f32.mrf.mxu1 }
 0x1e6   : > { %v680_v10 = vadd.f32 %v1013_v7, %v929_v5 }
 0x1e7   : > { %v1015_v11 = vpop.f32.mrf.mxu1 }
 0x1e8   : > { %v686_v13 = vmax.f32 %v680_v10, 0.0  ;;  %v1016_v14 = vadd.f32 %v1015_v11, %v1014_v9 }
 0x1ea   : > { %v683_v15 = vadd.f32 %v1016_v14, %v929_v5  ;;  %v808_v16 = vadd.f32 %v802_v12, %v686_v13 }
 0x1ec   : > { %v687_v18 = vmax.f32 %v683_v15, 0.0  ;;  %v810_v20 = vmax.f32 %v808_v16, 0.0 }
 0x1ee   : > { %v809_v19 = vadd.f32 %v805_v17, %v687_v18 }
 0x1f0   : > { %v811_v21 = vmax.f32 %v809_v19, 0.0 }
 0x1f2   : > { %v971_v22 = vpack.c.bf16 %v811_v21, %v810_v20 }
 0x1f4   : > { %972 = vst [vmem:[%s308_s27] sm:$0xff] %v971_v22  }
 0x1f5 PF: > { %s19_s24 = sadd.s32 1, %s1187_s24  }
 0x1f6   : > { %p16_p3 = scmp.ge.s32.totalorder %s19_s24, 4  }
 0x1f8   :  { %18 = sbr.rel (!%p16_p3) target bundleno = 2 (0x2), region = 87 }
 0x1fd   :  { %843 = vsyncpa [#allocation5], 1 }
 0x1fe   :  { %845 = vsyncpa [#allocation5 + $0x1], 1 }
 0x1ff   :  { %846 = vsyncpa [#allocation7], 1 }

</bundles_post_ra>
